<compile_context>
chip_gen: v6e
topology: v6e:2x2x1
jax: 0.10.0
libtpu: 0.0.40
codegen_flags: <defaults>
</compile_context>

<pallas_src>
import functools

import jax
import jax.numpy as jnp
from jax.experimental import pallas as pl
from jax.experimental.pallas import tpu as pltpu


def markov_cbam_kernel(coef_ref, x_ref, w1_ref, b1_ref, w2_ref, b2_ref, wc_ref,
                       o_ref, *, hw_true):
    """One grid step = TB batch elements.

    coef_ref : SMEM (4,)           composed Markov coefficients [a, b, g, d]
    x_ref    : VMEM (TB, C, HW)    f32 activations
    w1_ref   : VMEM (hid, C)       fc1 weight (PyTorch layout), f32
    b1_ref   : VMEM (hid, 1)       fc1 bias (column), f32
    w2_ref   : VMEM (C, hid)       fc2 weight (PyTorch layout), f32
    b2_ref   : VMEM (C, 1)         fc2 bias (column), f32
    wc_ref   : VMEM (1, C)         1x1 conv weight, f32
    o_ref    : VMEM (TB, C, HW)    f32 output
    """
    a = coef_ref[0]
    b = coef_ref[1]
    g = coef_ref[2]
    d = coef_ref[3]
    inv_hw = jnp.float32(1.0 / hw_true)

    tb = x_ref.shape[0]

    # ---- channel attention, batched across the TB batch elements ---------
    # Global avg pool over the spatial (lane) axis -> (TB, C), transposed to
    # (C, TB) so the two fc layers run as single MXU dots with N = TB instead
    # of TB separate N=1 matvecs.
    avg_ct = (jnp.sum(x_ref[...], axis=2) * inv_hw).T                 # (C, TB)
    h = jnp.dot(w1_ref[...], avg_ct,
                preferred_element_type=jnp.float32) + b1_ref[...]     # (hid, TB)
    h = jnp.maximum(h, 0.0)          # stochasticReLU (deterministic branch)
    ca_ct = jnp.dot(w2_ref[...], h,
                    preferred_element_type=jnp.float32) + b2_ref[...]  # (C, TB)

    lane_t = jax.lax.broadcasted_iota(jnp.int32, (1, tb), 1)           # (1, TB)

    # ---- per-batch-element epilogue (bounded live ranges via fori_loop) ---
    def body(t, carry):
        x_t = x_ref[t]                                                 # (C, HW)
        # spatial attention: 1x1 conv (C -> 1, no bias) -> sigmoid
        sa_t = jax.nn.sigmoid(
            jnp.dot(wc_ref[...], x_t,
                    preferred_element_type=jnp.float32))               # (1, HW)
        # select column t of the batched channel attention without any
        # dynamic lane slicing (one-hot select + lane reduce, tiny).
        ca_t = jnp.sum(jnp.where(lane_t == t, ca_ct, 0.0),
                       axis=1, keepdims=True)                          # (C, 1)
        # Markov chain (coefficients pre-composed on host)
        c_fin = a * ca_t + b * sa_t                                    # (C, HW)
        s_fin = g * ca_t + d * sa_t                                    # (C, HW)
        o_ref[t] = (x_t * c_fin * s_fin).astype(o_ref.dtype)
        return carry

    jax.lax.fori_loop(0, tb, body, 0)


def _vmem_capacity_bytes():
    try:
        cap = getattr(pltpu.get_tpu_info(), "vmem_capacity_bytes", None)
        if cap:
            return int(cap)
    except Exception:
        pass
    return 64 * 1024 * 1024          # conservative fallback (v7x per-TC)


def _choose_batch_tile(B, C, HW, target_bytes):
    """How many batch elements to fuse per grid step (f32 activations)."""
    per_batch = C * HW * 4
    tb = max(1, min(B, target_bytes // max(per_batch, 1)))
    # Prefer a divisor of B (no partial tail block) if one is within 2x of
    # the target; otherwise accept a non-divisor and a cdiv grid with a
    # partial tail block rather than collapsing to a tiny TB.
    for cand in range(tb, 0, -1):
        if B % cand == 0:
            if 2 * cand >= tb:
                return cand
            break
    return tb


def markov_cbam_forward(x, w1, b1, w2, b2, wc, transition):
    """x: (B, C, H, W) float32. Returns (B, C, H, W) float32."""
    B, C, H, W = x.shape
    HW = H * W
    hidden = w1.shape[0]

    # Compose the Markov transitions on host (tiny 2x2 chain):
    #   [c_fin, s_fin]^T = M @ [c_att, s_att]^T
    M = jnp.eye(2, dtype=jnp.float32)
    for i in range(transition.shape[0] - 1):
        P = jax.nn.softmax(transition[i].astype(jnp.float32), axis=0)
        M = P @ M
    coeffs = jnp.stack([M[0, 0], M[0, 1], M[1, 0], M[1, 1]]).astype(jnp.float32)

    x_flat = x.reshape(B, C, HW)          # metadata-only, no HBM pass

    b1c = b1.reshape(hidden, 1).astype(jnp.float32)
    b2c = b2.reshape(C, 1).astype(jnp.float32)
    wc2 = wc.reshape(1, C).astype(jnp.float32)

    vmem_cap = _vmem_capacity_bytes()
    target_tile_bytes = min(8 * 1024 * 1024, vmem_cap // 12)
    TB = _choose_batch_tile(B, C, HW, target_tile_bytes)
    grid = (pl.cdiv(B, TB),)

    tile_bytes = TB * C * HW * 4
    # double-buffered in + out (~4x tile) + in-kernel per-element temps + slack
    vmem_limit = int(min(int(vmem_cap * 3 // 4),
                         max(16 * 1024 * 1024, 6 * tile_bytes + (4 << 20))))

    kernel = functools.partial(markov_cbam_kernel, hw_true=HW)

    out = pl.pallas_call(
        kernel,
        out_shape=jax.ShapeDtypeStruct((B, C, HW), jnp.float32),
        grid=grid,
        in_specs=[
            pl.BlockSpec(memory_space=pltpu.MemorySpace.SMEM),       # coeffs
            pl.BlockSpec((TB, C, HW), lambda bi: (bi, 0, 0)),        # x
            pl.BlockSpec((hidden, C), lambda bi: (0, 0)),            # w1
            pl.BlockSpec((hidden, 1), lambda bi: (0, 0)),            # b1
            pl.BlockSpec((C, hidden), lambda bi: (0, 0)),            # w2
            pl.BlockSpec((C, 1), lambda bi: (0, 0)),                 # b2
            pl.BlockSpec((1, C), lambda bi: (0, 0)),                 # wc
        ],
        out_specs=pl.BlockSpec((TB, C, HW), lambda bi: (bi, 0, 0)),
        compiler_params=pltpu.CompilerParams(
            dimension_semantics=("parallel",),
            vmem_limit_bytes=vmem_limit),
    )(coeffs, x_flat.astype(jnp.float32), w1.astype(jnp.float32), b1c,
      w2.astype(jnp.float32), b2c, wc2)

    return out.reshape(B, C, H, W)        # metadata-only, no HBM pass


def reference_forward(x, w1, b1, w2, b2, wc, transition):
    """Pure-JAX f32 reference (deterministic ReLU branch)."""
    avg = x.mean(axis=(2, 3))                                      # (B, C)
    h = jnp.maximum(avg @ w1.T + b1, 0.0)                          # (B, hid)
    ca = (h @ w2.T + b2)[:, :, None, None]                         # (B, C, 1, 1)
    sa = jax.nn.sigmoid(
        jnp.einsum('c,bchw->bhw', wc, x))[:, None, :, :]           # (B, 1, H, W)
    c_att, s_att = ca, sa
    for i in range(transition.shape[0] - 1):
        P = jax.nn.softmax(transition[i], axis=0)
        c_next = c_att * P[0, 0] + s_att * P[0, 1]
        s_next = c_att * P[1, 0] + s_att * P[1, 1]
        c_att, s_att = c_next, s_next
    return x * c_att * s_att


if __name__ == "__main__":
    # Small shapes consistent with the module: channels >= reduction.
    B, C, H, W = 2, 32, 16, 16
    reduction = 16
    num_layers = 3
    hidden = C // reduction

    key = jax.random.PRNGKey(0)
    kx, k1, k2, k3, k4, k5, k6 = jax.random.split(key, 7)

    x = jax.random.normal(kx, (B, C, H, W), dtype=jnp.float32)

    # Deterministic synthetic parameters (PyTorch param shapes).
    w1 = jax.random.normal(k1, (hidden, C), dtype=jnp.float32) * 0.1   # fc1.weight
    b1 = jax.random.normal(k2, (hidden,), dtype=jnp.float32) * 0.1     # fc1.bias
    w2 = jax.random.normal(k3, (C, hidden), dtype=jnp.float32) * 0.1   # fc2.weight
    b2 = jax.random.normal(k4, (C,), dtype=jnp.float32) * 0.1          # fc2.bias
    wc = jax.random.normal(k5, (C,), dtype=jnp.float32) * 0.1          # conv1.weight (1,C,1,1)
    transition = jax.random.normal(k6, (num_layers, 2, 2), dtype=jnp.float32)

    out = markov_cbam_forward(x, w1, b1, w2, b2, wc, transition)
    out = jax.block_until_ready(out)

    ref = reference_forward(x, w1, b1, w2, b2, wc, transition)
    assert out.shape == (B, C, H, W)
    # f32 end-to-end now; only MXU precision differences remain.
    max_err = float(jnp.max(jnp.abs(out - ref)))
    assert jnp.allclose(out, ref, atol=1e-2, rtol=1e-2), max_err

    print("KERNEL_OK")
</pallas_src>

<mosaic_0001>
module attributes {stable_mosaic.version = 11 : i64} {
  func.func @markov_cbam_kernel(%arg0: i32, %arg1: memref<4xf32, #tpu.memory_space<smem>>, %arg2: memref<2x32x256xf32, #tpu.memory_space<vmem>>, %arg3: memref<2x32xf32, #tpu.memory_space<vmem>>, %arg4: memref<2x1xf32, #tpu.memory_space<vmem>>, %arg5: memref<32x2xf32, #tpu.memory_space<vmem>>, %arg6: memref<32x1xf32, #tpu.memory_space<vmem>>, %arg7: memref<1x32xf32, #tpu.memory_space<vmem>>, %arg8: memref<2x32x256xf32, #tpu.memory_space<vmem>>) attributes {dimension_semantics = [#tpu.dimension_semantics<parallel>], iteration_bounds = array<i64: 1>, scalar_prefetch = 0 : i64, scratch_operands = 0 : i64, tpu.core_type = #tpu.core_type<tc>, window_params = [{transform_indices = @transform_0, window_bounds = array<i64: 4>}, {transform_indices = @transform_1, window_bounds = array<i64: 2, 32, 256>}, {pipeline_mode = #tpu.pipeline_mode<synchronous>, transform_indices = @transform_2, window_bounds = array<i64: 2, 32>}, {pipeline_mode = #tpu.pipeline_mode<synchronous>, transform_indices = @transform_3, window_bounds = array<i64: 2, 1>}, {pipeline_mode = #tpu.pipeline_mode<synchronous>, transform_indices = @transform_4, window_bounds = array<i64: 32, 2>}, {pipeline_mode = #tpu.pipeline_mode<synchronous>, transform_indices = @transform_5, window_bounds = array<i64: 32, 1>}, {pipeline_mode = #tpu.pipeline_mode<synchronous>, transform_indices = @transform_6, window_bounds = array<i64: 1, 32>}, {transform_indices = @transform_7, window_bounds = array<i64: 2, 32, 256>}]} {
    %c0 = arith.constant 0 : index
    %0 = memref.load %arg1[%c0] : memref<4xf32, #tpu.memory_space<smem>>
    %c1 = arith.constant 1 : index
    %1 = memref.load %arg1[%c1] : memref<4xf32, #tpu.memory_space<smem>>
    %c2 = arith.constant 2 : index
    %2 = memref.load %arg1[%c2] : memref<4xf32, #tpu.memory_space<smem>>
    %c3 = arith.constant 3 : index
    %3 = memref.load %arg1[%c3] : memref<4xf32, #tpu.memory_space<smem>>
    %c0_0 = arith.constant 0 : index
    %c0_1 = arith.constant 0 : index
    %c0_2 = arith.constant 0 : index
    %4 = vector.load %arg2[%c0_0, %c0_1, %c0_2] : memref<2x32x256xf32, #tpu.memory_space<vmem>>, vector<2x32x256xf32>
    %cst = arith.constant dense<0.000000e+00> : vector<2x32xf32>
    %5 = vector.multi_reduction <add>, %4, %cst [2] : vector<2x32x256xf32> to vector<2x32xf32>
    %cst_3 = arith.constant 3.906250e-03 : f32
    %6 = vector.broadcast %cst_3 : f32 to vector<2x32xf32>
    %7 = arith.mulf %5, %6 : vector<2x32xf32>
    %8 = tpu.transpose %7, [1, 0] : vector<2x32xf32> -> vector<32x2xf32>
    %c0_4 = arith.constant 0 : index
    %c0_5 = arith.constant 0 : index
    %9 = vector.load %arg3[%c0_4, %c0_5] : memref<2x32xf32, #tpu.memory_space<vmem>>, vector<2x32xf32>
    %cst_6 = arith.constant dense<0.000000e+00> : vector<2x2xf32>
    %10 = tpu.matmul %9, %8, %cst_6 {dimension_numbers = #tpu.dot_dimension_numbers<[1], [0], [0], [1], [0, 0, 1, 1], [], []>} : vector<2x32xf32>, vector<32x2xf32>, vector<2x2xf32> -> vector<2x2xf32>
    %c0_7 = arith.constant 0 : index
    %c0_8 = arith.constant 0 : index
    %11 = vector.load %arg4[%c0_7, %c0_8] : memref<2x1xf32, #tpu.memory_space<vmem>>, vector<2x1xf32>
    %12 = vector.broadcast %11 : vector<2x1xf32> to vector<2x2xf32>
    %13 = arith.addf %10, %12 : vector<2x2xf32>
    %cst_9 = arith.constant 0.000000e+00 : f32
    %14 = vector.broadcast %cst_9 : f32 to vector<2x2xf32>
    %15 = arith.maximumf %13, %14 : vector<2x2xf32>
    %c0_10 = arith.constant 0 : index
    %c0_11 = arith.constant 0 : index
    %16 = vector.load %arg5[%c0_10, %c0_11] : memref<32x2xf32, #tpu.memory_space<vmem>>, vector<32x2xf32>
    %cst_12 = arith.constant dense<0.000000e+00> : vector<32x2xf32>
    %17 = tpu.matmul %16, %15, %cst_12 {dimension_numbers = #tpu.dot_dimension_numbers<[1], [0], [0], [1], [0, 0, 1, 1], [], []>} : vector<32x2xf32>, vector<2x2xf32>, vector<32x2xf32> -> vector<32x2xf32>
    %c0_13 = arith.constant 0 : index
    %c0_14 = arith.constant 0 : index
    %18 = vector.load %arg6[%c0_13, %c0_14] : memref<32x1xf32, #tpu.memory_space<vmem>>, vector<32x1xf32>
    %19 = vector.broadcast %18 : vector<32x1xf32> to vector<32x2xf32>
    %20 = arith.addf %17, %19 : vector<32x2xf32>
    %21 = tpu.iota {dimensions = array<i32: 1>} : vector<1x2xi32>
    %c0_i32 = arith.constant 0 : i32
    %c2_i32 = arith.constant 2 : i32
    %22 = arith.addi %c0_i32, %c2_i32 : i32
    %c1_i32 = arith.constant 1 : i32
    scf.for %arg9 = %c0_i32 to %22 step %c1_i32  : i32 {
      %23 = arith.index_cast %arg9 : i32 to index
      %c0_16 = arith.constant 0 : index
      %c0_17 = arith.constant 0 : index
      %24 = vector.load %arg2[%23, %c0_16, %c0_17] : memref<2x32x256xf32, #tpu.memory_space<vmem>>, vector<1x32x256xf32>
      %25 = vector.shape_cast %24 : vector<1x32x256xf32> to vector<32x256xf32>
      %c0_18 = arith.constant 0 : index
      %c0_19 = arith.constant 0 : index
      %26 = vector.load %arg7[%c0_18, %c0_19] : memref<1x32xf32, #tpu.memory_space<vmem>>, vector<1x32xf32>
      %cst_20 = arith.constant dense<0.000000e+00> : vector<1x256xf32>
      %27 = tpu.matmul %26, %25, %cst_20 {dimension_numbers = #tpu.dot_dimension_numbers<[1], [0], [0], [1], [0, 0, 1, 1], [], []>} : vector<1x32xf32>, vector<32x256xf32>, vector<1x256xf32> -> vector<1x256xf32>
      %28 = arith.negf %27 : vector<1x256xf32>
      %29 = math.exp %28 : vector<1x256xf32>
      %cst_21 = arith.constant 1.000000e+00 : f32
      %30 = vector.broadcast %cst_21 : f32 to vector<1x256xf32>
      %31 = arith.addf %30, %29 : vector<1x256xf32>
      %32 = arith.divf %30, %31 : vector<1x256xf32>
      %33 = vector.broadcast %arg9 : i32 to vector<1x2xi32>
      %34 = arith.cmpi eq, %21, %33 : vector<1x2xi32>
      %cst_22 = arith.constant 0.000000e+00 : f32
      %35 = vector.shape_cast %34 : vector<1x2xi1> to vector<1x2xi1>
      %36 = vector.broadcast %35 : vector<1x2xi1> to vector<32x2xi1>
      %37 = vector.broadcast %cst_22 : f32 to vector<32x2xf32>
      %38 = arith.select %36, %20, %37 : vector<32x2xi1>, vector<32x2xf32>
      %cst_23 = arith.constant dense<0.000000e+00> : vector<32xf32>
      %39 = vector.multi_reduction <add>, %38, %cst_23 [1] : vector<32x2xf32> to vector<32xf32>
      %40 = vector.shape_cast %39 : vector<32xf32> to vector<32x1xf32>
      %41 = vector.broadcast %0 : f32 to vector<32x1xf32>
      %42 = arith.mulf %41, %40 : vector<32x1xf32>
      %43 = vector.broadcast %1 : f32 to vector<1x256xf32>
      %44 = arith.mulf %43, %32 : vector<1x256xf32>
      %45 = vector.broadcast %42 : vector<32x1xf32> to vector<32x256xf32>
      %46 = vector.broadcast %44 : vector<1x256xf32> to vector<32x256xf32>
      %47 = arith.addf %45, %46 : vector<32x256xf32>
      %48 = vector.broadcast %2 : f32 to vector<32x1xf32>
      %49 = arith.mulf %48, %40 : vector<32x1xf32>
      %50 = vector.broadcast %3 : f32 to vector<1x256xf32>
      %51 = arith.mulf %50, %32 : vector<1x256xf32>
      %52 = vector.broadcast %49 : vector<32x1xf32> to vector<32x256xf32>
      %53 = vector.broadcast %51 : vector<1x256xf32> to vector<32x256xf32>
      %54 = arith.addf %52, %53 : vector<32x256xf32>
      %55 = arith.mulf %25, %47 : vector<32x256xf32>
      %56 = arith.mulf %55, %54 : vector<32x256xf32>
      %57 = arith.index_cast %arg9 : i32 to index
      %c0_24 = arith.constant 0 : index
      %c0_25 = arith.constant 0 : index
      %58 = vector.load %arg8[%57, %c0_24, %c0_25] : memref<2x32x256xf32, #tpu.memory_space<vmem>>, vector<1x32x256xf32>
      %59 = vector.shape_cast %58 : vector<1x32x256xf32> to vector<32x256xf32>
      %60 = vector.shape_cast %56 : vector<32x256xf32> to vector<1x32x256xf32>
      tpu.vector_store %arg8[%57, %c0_24, %c0_25], %60 {strides = array<i32>} : memref<2x32x256xf32, #tpu.memory_space<vmem>>, vector<1x32x256xf32>,
    }
    %c2_i32_15 = arith.constant 2 : i32
    return
  }
  func.func @transform_0(%arg0: i32) -> i32 {
    %c0_i32 = arith.constant 0 : i32
    %c0_i32_0 = arith.constant 0 : i32
    return %c0_i32 : i32
  }
  func.func @transform_1(%arg0: i32) -> (i32, i32, i32) {
    %c0_i32 = arith.constant 0 : i32
    %c0_i32_0 = arith.constant 0 : i32
    %c0_i32_1 = arith.constant 0 : i32
    return %arg0, %c0_i32, %c0_i32_0 : i32, i32, i32
  }
  func.func @transform_2(%arg0: i32) -> (i32, i32) {
    %c0_i32 = arith.constant 0 : i32
    %c0_i32_0 = arith.constant 0 : i32
    %c0_i32_1 = arith.constant 0 : i32
    return %c0_i32, %c0_i32_0 : i32, i32
  }
  func.func @transform_3(%arg0: i32) -> (i32, i32) {
    %c0_i32 = arith.constant 0 : i32
    %c0_i32_0 = arith.constant 0 : i32
    %c0_i32_1 = arith.constant 0 : i32
    return %c0_i32, %c0_i32_0 : i32, i32
  }
  func.func @transform_4(%arg0: i32) -> (i32, i32) {
    %c0_i32 = arith.constant 0 : i32
    %c0_i32_0 = arith.constant 0 : i32
    %c0_i32_1 = arith.constant 0 : i32
    return %c0_i32, %c0_i32_0 : i32, i32
  }
  func.func @transform_5(%arg0: i32) -> (i32, i32) {
    %c0_i32 = arith.constant 0 : i32
    %c0_i32_0 = arith.constant 0 : i32
    %c0_i32_1 = arith.constant 0 : i32
    return %c0_i32, %c0_i32_0 : i32, i32
  }
  func.func @transform_6(%arg0: i32) -> (i32, i32) {
    %c0_i32 = arith.constant 0 : i32
    %c0_i32_0 = arith.constant 0 : i32
    %c0_i32_1 = arith.constant 0 : i32
    return %c0_i32, %c0_i32_0 : i32, i32
  }
  func.func @transform_7(%arg0: i32) -> (i32, i32, i32) {
    %c0_i32 = arith.constant 0 : i32
    %c0_i32_0 = arith.constant 0 : i32
    %c0_i32_1 = arith.constant 0 : i32
    return %arg0, %c0_i32, %c0_i32_0 : i32, i32, i32
  }
}

</mosaic_0001>

<bundles_post_ra>
// kernel: tpu_custom_call.1
= control target key start
LH: loop header
LB: loop body
LE: loop exit
PB: predicated region body
PF: predicated region fallthrough
CT: control target
= control target key end

     0   :  { %12 = vsyncpa [#allocation5], 0  ;;  %s932_s0 = inlined_call_operand.vmem [shape: f32[4], index: 0, kind: input, shape index: {}]   ;;  %s933_s1 = inlined_call_operand.hbm [shape: f32[2,32,256], index: 1, kind: input, shape index: {}]   ;;  %s934_s2 = inlined_call_operand.vmem [shape: f32[2,32], index: 2, kind: input, shape index: {}]   ;;  %s935_s3 = inlined_call_operand.vmem [shape: f32[2,1], index: 3, kind: input, shape index: {}]   ;;  %s936_s4 = inlined_call_operand.vmem [shape: f32[32,2], index: 4, kind: input, shape index: {}]   ;;  %s937_s5 = inlined_call_operand.vmem [shape: f32[32,1], index: 5, kind: input, shape index: {}]   ;;  %s938_s6 = inlined_call_operand.vmem [shape: f32[1,32], index: 6, kind: input, shape index: {}]   ;;  %s939_s7 = inlined_call_operand.hbm [shape: f32[2,32,256], index: 7, kind: output, shape index: {}]  }
   0x1   :  { %13 = vsyncpa [#allocation3], 0 }
   0x2   :  { %14 = vsyncpa [#allocation4], 0  ;;  %s21_s26 = sshll.u32 %s932_s0, 4  ;;  %s22_s26 = int_to_ptr.vmem [resolvable:$true] %s21_s26 }
   0x3   :  { %s666_s27 = scalar_lea.vmem %s22_s26, 16  ;;  %p671_p1 = scmp.lt.s32.totalorder %s22_s26, %s22_s26 }
   0x4   :  { %p667_p0 = scmp.ne.s32.totalorder %s22_s26, %s666_s27  ;;  %p672_p2 = scmp.lt.s32.totalorder %s666_s27, %s666_s27 }
   0x6   :  { %p673_p3 = por %p672_p2, %p671_p1 }
   0x8   :  { %p674_p4 = pnand %p673_p3, %p667_p0 }
   0xa   :  { %677 = shalt.err (!%p674_p4)
}
   0xb   :  { %s732_s28 = smov [#allocation2]   ;;  %s733_s29 = smov [#allocation6]  }
   0xc   :  { %24 = dma.vmem_to_smem %s22_s26, 16, %s732_s28, [#allocation5]  }
   0xd   :  { %s30_s30 = sshll.u32 %s733_s29, 4  ;;  %s31_s30 = int_to_ptr.vmem [resolvable:$true] %s30_s30 }
   0xe   :  { %s686_s8 = scalar_lea.vmem %s31_s30, 2048  ;;  %p691_p6 = scmp.lt.s32.totalorder %s31_s30, %s31_s30 }
   0xf   :  { %p687_p5 = scmp.ne.s32.totalorder %s31_s30, %s686_s8  ;;  %p692_p7 = scmp.lt.s32.totalorder %s686_s8, %s686_s8 }
  0x11   :  { %p693_p8 = por %p692_p7, %p691_p6 }
  0x13   :  { %p694_p9 = pnand %p693_p8, %p687_p5 }
  0x15   :  { %697 = shalt.err (!%p694_p9)
}
  0x16   :  { %s734_s0 = smov 256   ;;  %s735_s9 = smov 16  }
  0x17   :  { %36 = dma.hbm_to_vmem [thread:$0]  %s933_s1, 2048, %s31_s30, [#allocation3], %s734_s0, %s734_s0, %s735_s9  }
  0x18   :  { %722 = dma.done.wait [#allocation5], 16  }
  0x19   :  { %723 = vsyncadd [#allocation5], 4294967280 }
  0x1a   :  { %724 = dma.done.wait [#allocation3], 2048  }
  0x1b   :  { %725 = vsyncadd [#allocation3], 4294965248 }
  0x1c   :  { %53 = sfence }
  0x1d   :  { %v66_v0 = vld [vmem:[#allocation6 + $0x40] sm:$0xff]  ;;  %v67_v1 = vld [vmem:[#allocation6 + $0x48] sm:$0xff]  ;;  %v68_v5 = vld [vmem:[#allocation6 + $0x50] sm:$0xff]  ;;  %s790_s1 = sld [smem:[#allocation2]]  ;;  %v736_v24 = vmov 0.0   ;;  %vm737_vm0 = vmmov 0   ;;  %v121_v27 = vlaneseq }
  0x1e   :  { %v58_v2 = vld [vmem:[#allocation6] sm:$0xff]  ;;  %v86_v3 = vadd.f32 %v67_v1, %v66_v0  ;;  %v59_v4 = vld [vmem:[#allocation6 + $0x8] sm:$0xff]  ;;  %v69_v6 = vld [vmem:[#allocation6 + $0x58] sm:$0xff]  ;;  %s792_s12 = sld [smem:[#allocation2 + $0x1]]  ;;  %626 = vmatprep.subr.mxu0 %v736_v24  ;;  %628 = vmatprep.mubr.msk.f32.mxu0 %vm737_vm0, %v736_v24  ;;  %v738_v26 = vmov 0   ;;  %vm132_vm1 = vcmask 130112  }
  0x1f   :  { %v74_v7 = vadd.f32 %v59_v4, %v58_v2  ;;  %v60_v8 = vld [vmem:[#allocation6 + $0x10] sm:$0xff]  ;;  %v61_v9 = vld [vmem:[#allocation6 + $0x18] sm:$0xff]  ;;  %v89_v10 = vadd.f32 %v69_v6, %v68_v5  ;;  %v70_v12 = vld [vmem:[#allocation6 + $0x60] sm:$0xff]  ;;  %s794_s13 = sld [smem:[#allocation2 + $0x2]]  ;;  %656 = vset.pattern.permute.xlu0 %v738_v26  ;;  %657 = vset.pattern.permute.xlu1 %v738_v26  ;;  %v801_v29 = vand.u32 127, %v121_v27  ;;  %v805_v34 = vshrl.u32 %v121_v27, 7 }
  0x20   :  { %87 = vadd.xlane.f32.xlu1 %v86_v3  ;;  %v77_v11 = vadd.f32 %v61_v9, %v60_v8  ;;  %v71_v13 = vld [vmem:[#allocation6 + $0x68] sm:$0xff]  ;;  %v62_v14 = vld [vmem:[#allocation6 + $0x20] sm:$0xff]  ;;  %v72_v18 = vld [vmem:[#allocation6 + $0x70] sm:$0xff]  ;;  %s796_s14 = sld [smem:[#allocation2 + $0x3]]  ;;  %vm139_vm2 = vcmask 195712   ;;  %vm146_vm3 = vcmask 261312  }
  0x21   :  { %75 = vadd.xlane.f32.xlu0 %v74_v7  ;;  %v63_v15 = vld [vmem:[#allocation6 + $0x28] sm:$0xff]  ;;  %v92_v16 = vadd.f32 %v71_v13, %v70_v12  ;;  %v73_v19 = vld [vmem:[#allocation6 + $0x78] sm:$0xff]  ;;  %v64_v20 = vld [vmem:[#allocation6 + $0x30] sm:$0xff]  ;;  %v127_v31 = vadd.s32 4294967288, %v801_v29  ;;  %v134_v33 = vadd.s32 4294967280, %v801_v29  ;;  %v141_v38 = vadd.s32 4294967272, %v801_v29 }
  0x22   :  { %v80_v17 = vadd.f32 %v63_v15, %v62_v14  ;;  %v65_v21 = vld [vmem:[#allocation6 + $0x38] sm:$0xff]  ;;  %v95_v22 = vadd.f32 %v73_v19, %v72_v18  ;;  %v107_v25 = vld [vmem:[%s935_s3] sm:$0x3]  ;;  %v125_v42 = vsub.s32 %v801_v29, %v805_v34  ;;  %vm167_vm4 = vcmask 1041409   ;;  %v251_v7 = vld [vmem:[%s937_s5 + $0x8] sm:$0xff]  ;;  %s854_s10 = smov 0  }
  0x23   :  { %v83_v23 = vadd.f32 %v65_v21, %v64_v20  ;;  %v130_v36 = vsub.s32 %v127_v31, %v805_v34  ;;  %v137_v40 = vsub.s32 %v134_v33, %v805_v34  ;;  %v144_v49 = vsub.s32 %v141_v38, %v805_v34  ;;  %v106_v4 = vld [vmem:[%s934_s2] sm:$0x3]  ;;  %v252_v8 = vld [vmem:[%s937_s5 + $0x10] sm:$0xff]  ;;  %v253_v9 = vld [vmem:[%s937_s5 + $0x18] sm:$0xff] }
  0x24   :  { %90 = vadd.xlane.f32.xlu1 %v89_v10  ;;  %vm169_vm5 = vcmask 261120   ;;  %v246_v5 = vld [vmem:[%s936_s4] sm:$0xff]  ;;  %vm274_vm6 = vcmask 15360   ;;  %vm287_vm7 = vcmask 1041408   ;;  %v247_v15 = vld [vmem:[%s936_s4 + $0x8] sm:$0xff] }
  0x25   :  { %78 = vadd.xlane.f32.xlu0 %v77_v11  ;;  %633 = vmatprep.mubr.msk.f32.mxu1 %vm274_vm6, %v246_v5  ;;  %v250_v6 = vld [vmem:[%s937_s5] sm:$0xff] }
  0x28   :  { %93 = vadd.xlane.f32.xlu1 %v92_v16  ;;  %v248_v16 = vld [vmem:[%s936_s4 + $0x10] sm:$0xff] }
  0x29   :  { %81 = vadd.xlane.f32.xlu0 %v80_v17  ;;  %v249_v17 = vld [vmem:[%s936_s4 + $0x18] sm:$0xff] }
  0x2c   :  { %96 = vadd.xlane.f32.xlu1 %v95_v22 }
  0x2d   :  { %84 = vadd.xlane.f32.xlu0 %v83_v23 }
  0x3d   :  { %256 = vperm.xlu1 %657, %v250_v6  }
  0x41   :  { %261 = vperm.xlu1 %657, %v251_v7  }
  0x43   :  { %110 = vperm.xlu0 %656, %v107_v25  }
  0x45   :  { %266 = vperm.xlu1 %657, %v252_v8  }
  0x49   :  { %271 = vperm.xlu1 %657, %v253_v9  }
  0xa9   :  { %v88_v28 = vpop.xlane.xlu1 %87 }
  0xaa   :  { %v76_v30 = vpop.xlane.xlu0 %75  ;;  %v102_v43 = vmul.f32 0.00390625, %v88_v28 }
  0xab   :  { %v98_v46 = vmul.f32 0.00390625, %v76_v30 }
  0xac   :  { %v151_v53 = vrot.slane %v102_v43, %v125_v42 }
  0xad   :  { %v91_v32 = vpop.xlane.xlu1 %90  ;;  %v126_v57 = vrot.slane %v98_v46, %v125_v42 }
  0xae   :  { %v79_v35 = vpop.xlane.xlu0 %78  ;;  %v103_v37 = vmul.f32 0.00390625, %v91_v32 }
  0xaf   :  { %v99_v39 = vmul.f32 0.00390625, %v79_v35 }
  0xb0   :  { %v155_v48 = vrot.slane %v103_v37, %v130_v36 }
  0xb1   :  { %v94_v41 = vpop.xlane.xlu1 %93  ;;  %v131_v50 = vrot.slane %v99_v39, %v130_v36 }
  0xb2   :  { %v104_v44 = vmul.f32 0.00390625, %v94_v41  ;;  %v82_v45 = vpop.xlane.xlu0 %81  ;;  %v156_v59 = vsel %vm132_vm1, %v155_v48, %v151_v53 }
  0xb3   :  { %v100_v47 = vmul.f32 0.00390625, %v82_v45  ;;  %v133_v61 = vsel %vm132_vm1, %v131_v50, %v126_v57 }
  0xb4   :  { %v160_v51 = vrot.slane %v104_v44, %v137_v40 }
  0xb5   :  { %v97_v52 = vpop.xlane.xlu1 %96  ;;  %v138_v54 = vrot.slane %v100_v47, %v137_v40 }
  0xb6   :  { %v105_v55 = vmul.f32 0.00390625, %v97_v52  ;;  %v85_v56 = vpop.xlane.xlu0 %84  ;;  %v161_v63 = vsel %vm139_vm2, %v160_v51, %v156_v59 }
  0xb7   :  { %v101_v58 = vmul.f32 0.00390625, %v85_v56  ;;  %v140_v0 = vsel %vm139_vm2, %v138_v54, %v133_v61 }
  0xb8   :  { %v165_v60 = vrot.slane %v105_v55, %v144_v49 }
  0xb9   :  { %v145_v62 = vrot.slane %v101_v58, %v144_v49  ;;  %v257_v18 = vpop.permute.xlu1 %256 }
  0xba   :  { %v166_v1 = vsel %vm146_vm3, %v165_v60, %v161_v63 }
  0xbb   :  { %v147_v2 = vsel %vm146_vm3, %v145_v62, %v140_v0 }
  0xbc   :  { %v168_v3 = vsel %vm167_vm4, %v166_v1, %v147_v2 }
  0xbd   :  { %627 = vmatpush3.xpose.msk.msra.mxu0 %vm169_vm5, %v168_v3  ;;  %v262_v19 = vpop.permute.xlu1 %261 }
  0xbe   :  { %v111_v10 = vpop.permute.xlu0 %110 }
  0xc0   :  { %629 = vmatmul.mubr.msk.f32.vlgmr.msra.gmra.mxu0 %vm169_vm5, %v106_v4 }
  0xc1   :  { %v267_v20 = vpop.permute.xlu1 %266 }
  0xc5   :  { %v272_v25 = vpop.permute.xlu1 %271 }
 0x180   :  { %v241_v11 = vpop.f32.mrf.mxu0 }
 0x181   :  { %v242_v12 = vadd.f32 %v241_v11, %v111_v10 }
 0x182   :  { %v630_v13 = vpop.f32.mrf.mxu0 }
 0x183   :  { %v245_v14 = vmax.f32 %v242_v12, 0.0 }
 0x185   :  { %631 = vmatprep.subr.msk.mxu1 %vm287_vm7, %v245_v14 }
 0x186   :  { %632 = vmatpush3.msk.msra.mxu1 %vm287_vm7, %v245_v14 }
 0x187   :  { %634 = vmatmul.mubr.msk.f32.vlgmr.msra.gmra.mxu1 %vm274_vm6, %v247_v15 }
 0x188   :  { %636 = vmatprep.mubr.msk.f32.mxu1 %vm274_vm6, %v248_v16 }
 0x18b   :  { %637 = vmatmul.mubr.msk.f32.gmra.mxu1 %vm274_vm6, %v249_v17 }
 0x247   :  { %v635_v21 = vpop.f32.mrf.mxu1 }
 0x248   :  { %v846_v22 = vadd.f32 %v635_v21, %v262_v19 }
 0x249   :  { %v357_v23 = vpop.f32.mrf.mxu1 }
 0x24a   :  { %v848_v24 = vadd.f32 %v357_v23, %v257_v18 }
 0x24b   :  { %v638_v26 = vpop.f32.mrf.mxu1 }
 0x24c   :  { %v850_v27 = vadd.f32 %v638_v26, %v272_v25 }
 0x24d   :  { %v367_v28 = vpop.f32.mrf.mxu1 }
 0x24e   :  { %v852_v30 = vadd.f32 %v367_v28, %v267_v20 }
 0x24f LB: > { %v739_v31 = vmov 0.0   ;;  %s617_s4 = sshll.u32 %s730_s10, 6  ;;  %v480_v32 = vstv %s730_s10  ;;  %v393_v51 = vld [vmem:[%s938_s6] sm:$0x1]  ;;  %v505_v62 = vstv %s792_s12  ;;  %v529_v63 = vstv %s796_s14  ;;  %s381_s10 = sadd.s32 1, %s730_s10   ;;  %s730_s10 = sphi %s854_s10, %s381_s10  }
 0x250   : > { %461 = vmatprep.mubr.f32.mxu0 %v739_v31  ;;  %vm862_vm8 = vcmp.eq.s32.totalorder %v801_v29, %v480_v32  ;;  %s384_s11 = scalar_lea.vmem [#allocation6], %s617_s4  ;;  %v500_v0 = vstv %s790_s1  ;;  %v510_v1 = vsub.s32 0, %v805_v34  ;;  %v524_v2 = vstv %s794_s13  ;;  %s565_s3 = scalar_lea.vmem [#allocation7], %s617_s4 }
 0x251   : > { %v868_v35 = vld [vmem:[%s384_s11 + $0x38] sm:$0xff]  ;;  %v870_v36 = vld [vmem:[%s384_s11 + $0x30] sm:$0xff]  ;;  %v872_v37 = vld [vmem:[%s384_s11 + $0x28] sm:$0xff]  ;;  %v486_v38 = vsel %vm862_vm8, %v852_v30, 0.0  ;;  %v484_v39 = vsel %vm862_vm8, %v848_v24, 0.0  ;;  %v487_v40 = vsel %vm862_vm8, %v850_v27, 0.0 }
 0x252   : > { %421 = vmatprep.subr.mxu0 %v868_v35  ;;  %v884_v41 = vld [vmem:[%s384_s11 + $0x20] sm:$0xff]  ;;  %v494_v42 = vsel %vm274_vm6, %v486_v38, 0.0  ;;  %v488_v43 = vsel %vm274_vm6, %v484_v39, 0.0  ;;  %v889_v44 = vld [vmem:[%s384_s11 + $0x18] sm:$0xff]  ;;  %v485_v45 = vsel %vm862_vm8, %v846_v22, 0.0  ;;  %v895_v46 = vld [vmem:[%s384_s11 + $0x10] sm:$0xff] }
 0x253   : > { %422 = vmatpush1.msra.mxu0 %v870_v36  ;;  %495 = vadd.xlane.f32.xlu1 %v494_v42  ;;  %v497_v47 = vsel %vm274_vm6, %v487_v40, 0.0  ;;  %v899_v48 = vld [vmem:[%s384_s11 + $0x8] sm:$0xff]  ;;  %v491_v49 = vsel %vm274_vm6, %v485_v45, 0.0  ;;  %v385_v50 = vld [vmem:[%s384_s11] sm:$0xff]  ;;  %p378_p10 = scmp.ge.s32.totalorder %s381_s10, 2  }
 0x254   : > { %423 = vmatprep.subr.mxu0 %v872_v37  ;;  %489 = vadd.xlane.f32.xlu0 %v488_v43  ;;  %s740_s17 = smov (%p378_p10), [#allocation7]  }
 0x255   : > { %424 = vmatpush1.msra.mxu0 %v884_v41  ;;  %s579_s18 = sshll.u32 (%p378_p10), %s740_s17, 4  ;;  %s580_s18 = int_to_ptr.vmem [resolvable:$true] %s579_s18 }
 0x256   : > { %425 = vmatprep.subr.mxu0 %v889_v44  ;;  %s698_s19 = scalar_lea.vmem (%p378_p10), %s580_s18, 2048  ;;  %p703_p12 = scmp.lt.s32.totalorder (%p378_p10), %s580_s18, %s580_s18 }
 0x257   : > { %426 = vmatpush1.msra.mxu0 %v895_v46  ;;  %498 = vadd.xlane.f32.xlu1 %v497_v47  ;;  %p699_p11 = scmp.ne.s32.totalorder (%p378_p10), %s580_s18, %s698_s19  ;;  %p704_p13 = scmp.lt.s32.totalorder (%p378_p10), %s698_s19, %s698_s19 }
 0x258   : > { %427 = vmatprep.subr.mxu0 %v899_v48  ;;  %492 = vadd.xlane.f32.xlu0 %v491_v49 }
 0x259   : > { %428 = vmatpush1.msra.mxu0 %v385_v50  ;;  %p705_p0 = por (%p378_p10), %p704_p13, %p703_p12 }
 0x25a   : > { %613 = vmatmul.mubr.msk.f32.vlgmr.msra.gmra.mxu0 %vm169_vm5, %v393_v51 }
 0x25b   :  { %p706_p1 = pnand (%p378_p10), %p705_p0, %p699_p11 }
 0x2dc   : > { %v496_v60 = vpop.xlane.xlu1 %495 }
 0x2dd   : > { %v490_v61 = vpop.xlane.xlu0 %489  ;;  %v503_v9 = vmul.f32 %v500_v0, %v496_v60  ;;  %v527_v10 = vmul.f32 %v524_v2, %v496_v60 }
 0x2de   : > { %v501_v17 = vmul.f32 %v500_v0, %v490_v61  ;;  %v525_v18 = vmul.f32 %v524_v2, %v490_v61 }
 0x2e0   : > { %v499_v3 = vpop.xlane.xlu1 %498 }
 0x2e1   : > { %v493_v7 = vpop.xlane.xlu0 %492  ;;  %v504_v11 = vmul.f32 %v500_v0, %v499_v3  ;;  %v528_v12 = vmul.f32 %v524_v2, %v499_v3 }
 0x2e2   : > { %v502_v19 = vmul.f32 %v500_v0, %v493_v7  ;;  %v526_v20 = vmul.f32 %v524_v2, %v493_v7 }
 0x31a   : > { %v463_v52 = vpop.f32.mrf.mxu0 }
 0x31b   : > { %v614_v53 = vmul.f32 -1.442695, %v463_v52 }
 0x31c   : > { %v465_v54 = vpop.f32.mrf.mxu0 }
 0x31d   : > { %658 = vpow2.f32 %v614_v53  ;;  %v615_v55 = vmul.f32 -1.442695, %v465_v54 }
 0x31f   : > { %660 = vpow2.f32 %v615_v55 }
 0x32a   : > { %v659_v56 = vpop.eup %658 }
 0x32b   : > { %v474_v57 = vadd.f32 1.0, %v659_v56 }
 0x32c   : > { %v661_v58 = vpop.eup %660 }
 0x32d   : > { %662 = vrcp.f32 %v474_v57  ;;  %v475_v59 = vadd.f32 1.0, %v661_v58 }
 0x32f   : > { %664 = vrcp.f32 %v475_v59 }
 0x33a   : > { %v663_v4 = vpop.eup %662 }
 0x33b   : > { %v506_v5 = vmul.f32 %v663_v4, %v505_v62  ;;  %v530_v6 = vmul.f32 %v663_v4, %v529_v63 }
 0x33c   : > { %v665_v8 = vpop.eup %664 }
 0x33d   : > { %v507_v13 = vmul.f32 %v665_v8, %v505_v62  ;;  %v511_v14 = vrot.slane %v506_v5, %v510_v1  ;;  %v531_v15 = vmul.f32 %v665_v8, %v529_v63  ;;  %v535_v16 = vrot.slane %v530_v6, %v510_v1 }
 0x33f   : > { %v515_v21 = vrot.slane %v507_v13, %v510_v1  ;;  %v520_v23 = vadd.f32 %v511_v14, %v503_v9  ;;  %v539_v25 = vrot.slane %v531_v15, %v510_v1  ;;  %v544_v26 = vadd.f32 %v535_v16, %v527_v10 }
 0x340   : > { %v516_v28 = vadd.f32 %v511_v14, %v501_v17  ;;  %v540_v31 = vadd.f32 %v535_v16, %v525_v18  ;;  %v522_v32 = vadd.f32 %v511_v14, %v504_v11  ;;  %v546_v33 = vadd.f32 %v535_v16, %v528_v12 }
 0x341   : > { %v521_v38 = vadd.f32 %v515_v21, %v503_v9  ;;  %v545_v39 = vadd.f32 %v539_v25, %v527_v10  ;;  %v552_v40 = vmul.f32 %v520_v23, %v884_v41  ;;  %v517_v42 = vadd.f32 %v515_v21, %v501_v17 }
 0x342   : > { %v541_v43 = vadd.f32 %v539_v25, %v525_v18  ;;  %v548_v45 = vmul.f32 %v516_v28, %v385_v50  ;;  %v523_v47 = vadd.f32 %v515_v21, %v504_v11  ;;  %v547_v49 = vadd.f32 %v539_v25, %v528_v12 }
 0x343   : > { %v553_v51 = vmul.f32 %v521_v38, %v872_v37  ;;  %v560_v52 = vmul.f32 %v552_v40, %v544_v26  ;;  %v549_v53 = vmul.f32 %v517_v42, %v899_v48  ;;  %v554_v54 = vmul.f32 %v522_v32, %v870_v36 }
 0x344   : > { %v556_v55 = vmul.f32 %v548_v45, %v540_v31  ;;  %v555_v56 = vmul.f32 %v523_v47, %v868_v35  ;;  %v518_v57 = vadd.f32 %v511_v14, %v502_v19  ;;  %v519_v58 = vadd.f32 %v515_v21, %v502_v19 }
 0x345   : > { %v561_v59 = vmul.f32 %v553_v51, %v545_v39  ;;  %570 = vst [vmem:[%s565_s3 + $0x20] sm:$0xff] %v560_v52  ;;  %v557_v41 = vmul.f32 %v549_v53, %v541_v43  ;;  %v562_v50 = vmul.f32 %v554_v54, %v546_v33  ;;  %v542_v60 = vadd.f32 %v535_v16, %v526_v20 }
 0x346   : > { %566 = vst [vmem:[%s565_s3] sm:$0xff] %v556_v55  ;;  %v563_v61 = vmul.f32 %v555_v56, %v547_v49  ;;  %v543_v37 = vadd.f32 %v539_v25, %v526_v20  ;;  %v550_v62 = vmul.f32 %v518_v57, %v895_v46  ;;  %v551_v48 = vmul.f32 %v519_v58, %v889_v44  ;;  %380 = sbr.rel (!%p378_p10) target bundleno = 591 (0x24f), region = 65 }
 0x347   : > { %571 = vst [vmem:[%s565_s3 + $0x28] sm:$0xff] %v561_v59  ;;  %567 = vst [vmem:[%s565_s3 + $0x8] sm:$0xff] %v557_v41 }
 0x348   : > { %572 = vst [vmem:[%s565_s3 + $0x30] sm:$0xff] %v562_v50  ;;  %573 = vst [vmem:[%s565_s3 + $0x38] sm:$0xff] %v563_v61  ;;  %v558_v35 = vmul.f32 %v550_v62, %v542_v60  ;;  %v559_v36 = vmul.f32 %v551_v48, %v543_v37 }
 0x34a   : > { %568 = vst [vmem:[%s565_s3 + $0x10] sm:$0xff] %v558_v35  ;;  %569 = vst [vmem:[%s565_s3 + $0x18] sm:$0xff] %v559_v36 }
 0x34b   :  { %709 = shalt.err (!%p706_p1)
}
 0x34c   :  { %585 = dma.vmem_to_hbm [thread:$0]  %s580_s18, 2048, %s939_s7, [#allocation4], %s734_s0, %s734_s0, %s735_s9  }
 0x34d   :  { %726 = dma.done.wait [#allocation4], 2048  }
 0x34e   :  { %727 = vsyncadd [#allocation4], 4294965248 }
 0x34f   :  { %589 = vsyncpa [#allocation3], 1 }
 0x350   :  { %590 = vsyncpa [#allocation4], 1 }
 0x351   :  { %591 = vsyncpa [#allocation5], 1 }

</bundles_post_ra>
